<compile_context>
chip_gen: v7x
topology: tpu7x:2x2x1
jax: 0.10.0
libtpu: 0.0.40
codegen_flags: <defaults>
</compile_context>

<pallas_src>
import functools

import jax
import jax.numpy as jnp
from jax import lax
from jax.experimental import pallas as pl
from jax.experimental.pallas import tpu as pltpu


def _round_up(n, m):
    return ((n + m - 1) // m) * m


def _mlp_kernel(x_ref,
                w1_ref, b1_ref,
                w2_ref, b2_ref,
                w3_ref, b3_ref,
                w4_ref, b4_ref,
                o_ref):
    """Fused forward pass for one (TB, in_features) batch tile, all in VMEM."""
    x = x_ref[...]  # already f32

    # Layer 1: in_features -> 32, ReLU
    h = jnp.dot(x, w1_ref[...], preferred_element_type=jnp.float32) + b1_ref[...]
    h = jnp.maximum(h, 0.0)

    # Layer 2: 32 -> 16, ReLU
    h = jnp.dot(h, w2_ref[...], preferred_element_type=jnp.float32) + b2_ref[...]
    h = jnp.maximum(h, 0.0)

    # Layer 3: 16 -> 8, ReLU
    h = jnp.dot(h, w3_ref[...], preferred_element_type=jnp.float32) + b3_ref[...]
    h = jnp.maximum(h, 0.0)

    # Dropout: nn.Dropout is identity in eval mode (inference forward semantics).
    # TODO(synk): training-mode dropout (scaled Bernoulli mask) not emitted.

    # Output layer: 8 -> 2
    logits = jnp.dot(h, w4_ref[...], preferred_element_type=jnp.float32) + b4_ref[...]

    # Closed-form 2-class log_softmax (avoids XLU max/sum reductions over a
    # 2-wide lane dim):
    #   out0 = -softplus(d),  out1 = -softplus(-d),  d = logits1 - logits0
    d = logits[:, 1:2] - logits[:, 0:1]                      # (TB, 1)
    t = jnp.log(1.0 + jnp.exp(-jnp.abs(d)))                  # stable softplus tail
    out0 = -(jnp.maximum(d, 0.0) + t)                        # log p(class 0)
    out1 = -(jnp.maximum(-d, 0.0) + t)                       # log p(class 1)

    col = lax.broadcasted_iota(jnp.int32, o_ref.shape, 1)    # (TB, 2) column ids
    o_ref[...] = jnp.where(col == 0, out0, out1).astype(o_ref.dtype)


@functools.partial(jax.jit, static_argnames=("block_rows",))
def link_classifier_forward(x, params, *, block_rows=512):
    """x: (B, in_features) float32. params: dict of (in,out) weights and (1,out) biases."""
    B, F_in = x.shape
    w1, b1 = params["w1"], params["b1"]
    w2, b2 = params["w2"], params["b2"]
    w3, b3 = params["w3"], params["b3"]
    w4, b4 = params["w4"], params["b4"]

    # Batch tile: large (pipelining-friendly) but never bigger than the padded batch.
    TB = min(block_rows, _round_up(B, 8))
    B_pad = _round_up(B, TB)
    if B_pad != B:
        x = jnp.pad(x, ((0, B_pad - B), (0, 0)))
    grid = (B_pad // TB,)

    # x / out: tiled along batch. Weights/biases: whole-array blocks with a
    # constant block index so Pallas keeps them resident across grid steps.
    x_spec = pl.BlockSpec((TB, F_in), lambda i: (i, 0))
    out_spec = pl.BlockSpec((TB, 2), lambda i: (i, 0))
    param_specs = [
        pl.BlockSpec(w1.shape, lambda i: (0, 0)),
        pl.BlockSpec(b1.shape, lambda i: (0, 0)),
        pl.BlockSpec(w2.shape, lambda i: (0, 0)),
        pl.BlockSpec(b2.shape, lambda i: (0, 0)),
        pl.BlockSpec(w3.shape, lambda i: (0, 0)),
        pl.BlockSpec(b3.shape, lambda i: (0, 0)),
        pl.BlockSpec(w4.shape, lambda i: (0, 0)),
        pl.BlockSpec(b4.shape, lambda i: (0, 0)),
    ]

    param_bytes = sum(int(p.size) * 4 for p in params.values())
    cost = pl.CostEstimate(
        flops=2 * B_pad * (F_in * 32 + 32 * 16 + 16 * 8 + 8 * 2),
        transcendentals=B_pad,  # one exp per row (closed-form log_softmax)
        bytes_accessed=B_pad * F_in * 4 + B_pad * 2 * 4 + param_bytes,
    )

    out = pl.pallas_call(
        _mlp_kernel,
        out_shape=jax.ShapeDtypeStruct((B_pad, 2), jnp.float32),
        grid=grid,
        in_specs=[x_spec] + param_specs,
        out_specs=out_spec,
        compiler_params=pltpu.CompilerParams(
            dimension_semantics=("parallel",)),  # v7x: shard tiles across both TCs
        cost_estimate=cost,
    )(x, w1, b1, w2, b2, w3, b3, w4, b4)

    return out[:B]


def init_params(key, in_features):
    """Deterministic parameter init matching the nn.Linear shapes.

    torch Linear(in, out) has weight (out, in); we store the transpose (in, out)
    so the kernel does x @ W. Uniform(-1/sqrt(in), 1/sqrt(in)) like torch default.
    """
    dims = [(in_features, 32), (32, 16), (16, 8), (8, 2)]
    params = {}
    for idx, (fin, fout) in enumerate(dims, start=1):
        key, kw, kb = jax.random.split(key, 3)
        bound = 1.0 / jnp.sqrt(jnp.float32(fin))
        params[f"w{idx}"] = jax.random.uniform(
            kw, (fin, fout), jnp.float32, minval=-bound, maxval=bound)
        params[f"b{idx}"] = jax.random.uniform(
            kb, (1, fout), jnp.float32, minval=-bound, maxval=bound)
    return params


def reference_forward(x, params):
    """Pure-JAX reference for correctness checking."""
    h = jnp.maximum(x @ params["w1"] + params["b1"], 0.0)
    h = jnp.maximum(h @ params["w2"] + params["b2"], 0.0)
    h = jnp.maximum(h @ params["w3"] + params["b3"], 0.0)
    logits = h @ params["w4"] + params["b4"]
    return jax.nn.log_softmax(logits, axis=-1)


if __name__ == "__main__":
    key = jax.random.PRNGKey(0)
    in_features = 64
    batch = 8

    kx, kp, kx2 = jax.random.split(key, 3)
    x = jax.random.normal(kx, (batch, in_features), jnp.float32)
    params = init_params(kp, in_features)

    out = jax.block_until_ready(link_classifier_forward(x, params))
    ref = reference_forward(x, params)
    assert out.shape == (batch, 2)
    assert jnp.allclose(out, ref, atol=1e-5, rtol=1e-5), "mismatch vs reference (small batch)"

    # Exercise the multi-tile + ragged-tail path (grid of 3 tiles, padded tail).
    x2 = jax.random.normal(kx2, (300, in_features), jnp.float32)
    out2 = jax.block_until_ready(link_classifier_forward(x2, params, block_rows=128))
    ref2 = reference_forward(x2, params)
    assert out2.shape == (300, 2)
    assert jnp.allclose(out2, ref2, atol=1e-5, rtol=1e-5), "mismatch vs reference (tiled batch)"

    print("KERNEL_OK")
</pallas_src>

<mosaic_0001>
module attributes {stable_mosaic.version = 11 : i64} {
  func.func @_mlp_kernel(%arg0: i32, %arg1: memref<8x64xf32, #tpu.memory_space<vmem>>, %arg2: memref<64x32xf32, #tpu.memory_space<vmem>>, %arg3: memref<1x32xf32, #tpu.memory_space<vmem>>, %arg4: memref<32x16xf32, #tpu.memory_space<vmem>>, %arg5: memref<1x16xf32, #tpu.memory_space<vmem>>, %arg6: memref<16x8xf32, #tpu.memory_space<vmem>>, %arg7: memref<1x8xf32, #tpu.memory_space<vmem>>, %arg8: memref<8x2xf32, #tpu.memory_space<vmem>>, %arg9: memref<1x2xf32, #tpu.memory_space<vmem>>, %arg10: memref<8x2xf32, #tpu.memory_space<vmem>>) attributes {dimension_semantics = [#tpu.dimension_semantics<parallel>], iteration_bounds = array<i64: 1>, scalar_prefetch = 0 : i64, scratch_operands = 0 : i64, tpu.core_type = #tpu.core_type<tc>, window_params = [{transform_indices = @transform_0, window_bounds = array<i64: 8, 64>}, {pipeline_mode = #tpu.pipeline_mode<synchronous>, transform_indices = @transform_1, window_bounds = array<i64: 64, 32>}, {pipeline_mode = #tpu.pipeline_mode<synchronous>, transform_indices = @transform_2, window_bounds = array<i64: 1, 32>}, {pipeline_mode = #tpu.pipeline_mode<synchronous>, transform_indices = @transform_3, window_bounds = array<i64: 32, 16>}, {pipeline_mode = #tpu.pipeline_mode<synchronous>, transform_indices = @transform_4, window_bounds = array<i64: 1, 16>}, {pipeline_mode = #tpu.pipeline_mode<synchronous>, transform_indices = @transform_5, window_bounds = array<i64: 16, 8>}, {pipeline_mode = #tpu.pipeline_mode<synchronous>, transform_indices = @transform_6, window_bounds = array<i64: 1, 8>}, {pipeline_mode = #tpu.pipeline_mode<synchronous>, transform_indices = @transform_7, window_bounds = array<i64: 8, 2>}, {pipeline_mode = #tpu.pipeline_mode<synchronous>, transform_indices = @transform_8, window_bounds = array<i64: 1, 2>}, {transform_indices = @transform_9, window_bounds = array<i64: 8, 2>}]} {
    %c0 = arith.constant 0 : index
    %c0_0 = arith.constant 0 : index
    %0 = vector.load %arg1[%c0, %c0_0] : memref<8x64xf32, #tpu.memory_space<vmem>>, vector<8x64xf32>
    %c0_1 = arith.constant 0 : index
    %c0_2 = arith.constant 0 : index
    %1 = vector.load %arg2[%c0_1, %c0_2] : memref<64x32xf32, #tpu.memory_space<vmem>>, vector<64x32xf32>
    %cst = arith.constant dense<0.000000e+00> : vector<8x32xf32>
    %2 = tpu.matmul %0, %1, %cst {dimension_numbers = #tpu.dot_dimension_numbers<[1], [0], [0], [1], [0, 0, 1, 1], [], []>} : vector<8x64xf32>, vector<64x32xf32>, vector<8x32xf32> -> vector<8x32xf32>
    %c0_3 = arith.constant 0 : index
    %c0_4 = arith.constant 0 : index
    %3 = vector.load %arg3[%c0_3, %c0_4] : memref<1x32xf32, #tpu.memory_space<vmem>>, vector<1x32xf32>
    %4 = vector.broadcast %3 : vector<1x32xf32> to vector<8x32xf32>
    %5 = arith.addf %2, %4 : vector<8x32xf32>
    %cst_5 = arith.constant 0.000000e+00 : f32
    %6 = vector.broadcast %cst_5 : f32 to vector<8x32xf32>
    %7 = arith.maximumf %5, %6 : vector<8x32xf32>
    %c0_6 = arith.constant 0 : index
    %c0_7 = arith.constant 0 : index
    %8 = vector.load %arg4[%c0_6, %c0_7] : memref<32x16xf32, #tpu.memory_space<vmem>>, vector<32x16xf32>
    %cst_8 = arith.constant dense<0.000000e+00> : vector<8x16xf32>
    %9 = tpu.matmul %7, %8, %cst_8 {dimension_numbers = #tpu.dot_dimension_numbers<[1], [0], [0], [1], [0, 0, 1, 1], [], []>} : vector<8x32xf32>, vector<32x16xf32>, vector<8x16xf32> -> vector<8x16xf32>
    %c0_9 = arith.constant 0 : index
    %c0_10 = arith.constant 0 : index
    %10 = vector.load %arg5[%c0_9, %c0_10] : memref<1x16xf32, #tpu.memory_space<vmem>>, vector<1x16xf32>
    %11 = vector.broadcast %10 : vector<1x16xf32> to vector<8x16xf32>
    %12 = arith.addf %9, %11 : vector<8x16xf32>
    %cst_11 = arith.constant 0.000000e+00 : f32
    %13 = vector.broadcast %cst_11 : f32 to vector<8x16xf32>
    %14 = arith.maximumf %12, %13 : vector<8x16xf32>
    %c0_12 = arith.constant 0 : index
    %c0_13 = arith.constant 0 : index
    %15 = vector.load %arg6[%c0_12, %c0_13] : memref<16x8xf32, #tpu.memory_space<vmem>>, vector<16x8xf32>
    %cst_14 = arith.constant dense<0.000000e+00> : vector<8x8xf32>
    %16 = tpu.matmul %14, %15, %cst_14 {dimension_numbers = #tpu.dot_dimension_numbers<[1], [0], [0], [1], [0, 0, 1, 1], [], []>} : vector<8x16xf32>, vector<16x8xf32>, vector<8x8xf32> -> vector<8x8xf32>
    %c0_15 = arith.constant 0 : index
    %c0_16 = arith.constant 0 : index
    %17 = vector.load %arg7[%c0_15, %c0_16] : memref<1x8xf32, #tpu.memory_space<vmem>>, vector<1x8xf32>
    %18 = vector.broadcast %17 : vector<1x8xf32> to vector<8x8xf32>
    %19 = arith.addf %16, %18 : vector<8x8xf32>
    %cst_17 = arith.constant 0.000000e+00 : f32
    %20 = vector.broadcast %cst_17 : f32 to vector<8x8xf32>
    %21 = arith.maximumf %19, %20 : vector<8x8xf32>
    %c0_18 = arith.constant 0 : index
    %c0_19 = arith.constant 0 : index
    %22 = vector.load %arg8[%c0_18, %c0_19] : memref<8x2xf32, #tpu.memory_space<vmem>>, vector<8x2xf32>
    %cst_20 = arith.constant dense<0.000000e+00> : vector<8x2xf32>
    %23 = tpu.matmul %21, %22, %cst_20 {dimension_numbers = #tpu.dot_dimension_numbers<[1], [0], [0], [1], [0, 0, 1, 1], [], []>} : vector<8x8xf32>, vector<8x2xf32>, vector<8x2xf32> -> vector<8x2xf32>
    %c0_21 = arith.constant 0 : index
    %c0_22 = arith.constant 0 : index
    %24 = vector.load %arg9[%c0_21, %c0_22] : memref<1x2xf32, #tpu.memory_space<vmem>>, vector<1x2xf32>
    %25 = vector.broadcast %24 : vector<1x2xf32> to vector<8x2xf32>
    %26 = arith.addf %23, %25 : vector<8x2xf32>
    %27 = vector.extract_strided_slice %26 {offsets = [0, 1], sizes = [8, 1], strides = [1, 1]} : vector<8x2xf32> to vector<8x1xf32>
    %28 = vector.extract_strided_slice %26 {offsets = [0, 0], sizes = [8, 1], strides = [1, 1]} : vector<8x2xf32> to vector<8x1xf32>
    %29 = arith.subf %27, %28 : vector<8x1xf32>
    %30 = math.absf %29 : vector<8x1xf32>
    %cst_23 = arith.constant 0.000000e+00 : f32
    %31 = vector.broadcast %cst_23 : f32 to vector<8x1xf32>
    %32 = arith.subf %31, %30 : vector<8x1xf32>
    %33 = math.exp %32 : vector<8x1xf32>
    %cst_24 = arith.constant 1.000000e+00 : f32
    %34 = vector.broadcast %cst_24 : f32 to vector<8x1xf32>
    %35 = arith.addf %34, %33 : vector<8x1xf32>
    %36 = math.log %35 : vector<8x1xf32>
    %cst_25 = arith.constant 0.000000e+00 : f32
    %37 = vector.broadcast %cst_25 : f32 to vector<8x1xf32>
    %38 = arith.maximumf %29, %37 : vector<8x1xf32>
    %39 = arith.addf %38, %36 : vector<8x1xf32>
    %cst_26 = arith.constant 0.000000e+00 : f32
    %40 = vector.broadcast %cst_26 : f32 to vector<8x1xf32>
    %41 = arith.subf %40, %39 : vector<8x1xf32>
    %cst_27 = arith.constant 0.000000e+00 : f32
    %42 = vector.broadcast %cst_27 : f32 to vector<8x1xf32>
    %43 = arith.subf %42, %29 : vector<8x1xf32>
    %cst_28 = arith.constant 0.000000e+00 : f32
    %44 = vector.broadcast %cst_28 : f32 to vector<8x1xf32>
    %45 = arith.maximumf %43, %44 : vector<8x1xf32>
    %46 = arith.addf %45, %36 : vector<8x1xf32>
    %cst_29 = arith.constant 0.000000e+00 : f32
    %47 = vector.broadcast %cst_29 : f32 to vector<8x1xf32>
    %48 = arith.subf %47, %46 : vector<8x1xf32>
    %49 = tpu.iota {dimensions = array<i32: 1>} : vector<8x2xi32>
    %c0_i32 = arith.constant 0 : i32
    %50 = vector.broadcast %c0_i32 : i32 to vector<8x2xi32>
    %51 = arith.cmpi eq, %49, %50 : vector<8x2xi32>
    %52 = vector.shape_cast %41 : vector<8x1xf32> to vector<8x1xf32>
    %53 = vector.broadcast %52 : vector<8x1xf32> to vector<8x2xf32>
    %54 = vector.shape_cast %48 : vector<8x1xf32> to vector<8x1xf32>
    %55 = vector.broadcast %54 : vector<8x1xf32> to vector<8x2xf32>
    %56 = arith.select %51, %53, %55 : vector<8x2xi1>, vector<8x2xf32>
    %c0_30 = arith.constant 0 : index
    %c0_31 = arith.constant 0 : index
    %57 = vector.load %arg10[%c0_30, %c0_31] : memref<8x2xf32, #tpu.memory_space<vmem>>, vector<8x2xf32>
    tpu.vector_store %arg10[%c0_30, %c0_31], %56 {strides = array<i32>} : memref<8x2xf32, #tpu.memory_space<vmem>>, vector<8x2xf32>,
    return
  }
  func.func @transform_0(%arg0: i32) -> (i32, i32) {
    %c0_i32 = arith.constant 0 : i32
    %c0_i32_0 = arith.constant 0 : i32
    return %arg0, %c0_i32 : i32, i32
  }
  func.func @transform_1(%arg0: i32) -> (i32, i32) {
    %c0_i32 = arith.constant 0 : i32
    %c0_i32_0 = arith.constant 0 : i32
    %c0_i32_1 = arith.constant 0 : i32
    return %c0_i32, %c0_i32_0 : i32, i32
  }
  func.func @transform_2(%arg0: i32) -> (i32, i32) {
    %c0_i32 = arith.constant 0 : i32
    %c0_i32_0 = arith.constant 0 : i32
    %c0_i32_1 = arith.constant 0 : i32
    return %c0_i32, %c0_i32_0 : i32, i32
  }
  func.func @transform_3(%arg0: i32) -> (i32, i32) {
    %c0_i32 = arith.constant 0 : i32
    %c0_i32_0 = arith.constant 0 : i32
    %c0_i32_1 = arith.constant 0 : i32
    return %c0_i32, %c0_i32_0 : i32, i32
  }
  func.func @transform_4(%arg0: i32) -> (i32, i32) {
    %c0_i32 = arith.constant 0 : i32
    %c0_i32_0 = arith.constant 0 : i32
    %c0_i32_1 = arith.constant 0 : i32
    return %c0_i32, %c0_i32_0 : i32, i32
  }
  func.func @transform_5(%arg0: i32) -> (i32, i32) {
    %c0_i32 = arith.constant 0 : i32
    %c0_i32_0 = arith.constant 0 : i32
    %c0_i32_1 = arith.constant 0 : i32
    return %c0_i32, %c0_i32_0 : i32, i32
  }
  func.func @transform_6(%arg0: i32) -> (i32, i32) {
    %c0_i32 = arith.constant 0 : i32
    %c0_i32_0 = arith.constant 0 : i32
    %c0_i32_1 = arith.constant 0 : i32
    return %c0_i32, %c0_i32_0 : i32, i32
  }
  func.func @transform_7(%arg0: i32) -> (i32, i32) {
    %c0_i32 = arith.constant 0 : i32
    %c0_i32_0 = arith.constant 0 : i32
    %c0_i32_1 = arith.constant 0 : i32
    return %c0_i32, %c0_i32_0 : i32, i32
  }
  func.func @transform_8(%arg0: i32) -> (i32, i32) {
    %c0_i32 = arith.constant 0 : i32
    %c0_i32_0 = arith.constant 0 : i32
    %c0_i32_1 = arith.constant 0 : i32
    return %c0_i32, %c0_i32_0 : i32, i32
  }
  func.func @transform_9(%arg0: i32) -> (i32, i32) {
    %c0_i32 = arith.constant 0 : i32
    %c0_i32_0 = arith.constant 0 : i32
    return %arg0, %c0_i32 : i32, i32
  }
}

</mosaic_0001>

<bundles_post_ra>
// kernel: link_classifier_forward.1
= control target key start
LH: loop header
LB: loop body
LE: loop exit
PB: predicated region body
PF: predicated region fallthrough
CT: control target
= control target key end

     0   :  { %v515_v0 = vmov 0.0|0.0   ;;  %vm516_vm0 = vmmov 0   ;;  %v517_v4 = vmov 0.0   ;;  %vm48_vm1 = vcmask 523264   ;;  %s637_s1 = inlined_call_operand.vmem [shape: f32[64,32], index: 1, kind: input, shape index: {}]   ;;  %s638_s3 = inlined_call_operand.vmem [shape: f32[32,16], index: 3, kind: input, shape index: {}]   ;;  %s639_s0 = inlined_call_operand.vmem [shape: f32[8,64], index: 0, kind: input, shape index: {}]   ;;  %s640_s2 = inlined_call_operand.vmem [shape: f32[1,32], index: 2, kind: input, shape index: {}]   ;;  %s641_s5 = inlined_call_operand.vmem [shape: f32[16,8], index: 5, kind: input, shape index: {}]   ;;  %s642_s4 = inlined_call_operand.vmem [shape: f32[1,16], index: 4, kind: input, shape index: {}]   ;;  %s643_s7 = inlined_call_operand.vmem [shape: f32[8,2], index: 7, kind: input, shape index: {}]   ;;  %s644_s6 = inlined_call_operand.vmem [shape: f32[1,8], index: 6, kind: input, shape index: {}]   ;;  %s645_s8 = inlined_call_operand.vmem [shape: f32[1,2], index: 8, kind: input, shape index: {}]   ;;  %s646_s9 = inlined_call_operand.vmem [shape: f32[8,2], index: 9, kind: output, shape index: {}]  }
   0x1   :  { %483 = vmatprep.subr.bf16.mxu0 %v515_v0  ;;  %v33_v1 = vld [vmem:[%s637_s1] sm:$0xff]  ;;  %v34_v2 = vld [vmem:[%s637_s1 + $0x8] sm:$0xff]  ;;  %v35_v3 = vld [vmem:[%s637_s1 + $0x10] sm:$0xff]  ;;  %457 = vmatprep.mubr.msk.f32.mxu0 %vm516_vm0, %v517_v4  ;;  %vm134_vm2 = vcmask 261120   ;;  %vm218_vm3 = vcmask 130048   ;;  %vm301_vm4 = vcmask 64512   ;;  %v394_v61 = vlaneseq }
   0x2   :  { %v484_v5 = vpack.c.bf16 %v34_v2, %v33_v1  ;;  %v36_v6 = vld [vmem:[%s637_s1 + $0x18] sm:$0xff]  ;;  %495 = vmatprep.subr.bf16.mxu1 %v515_v0  ;;  %468 = vmatprep.mubr.msk.f32.mxu1 %vm516_vm0, %v517_v4  ;;  %v123_v8 = vld [vmem:[%s638_s3] sm:$0xff]  ;;  %v124_v9 = vld [vmem:[%s638_s3 + $0x8] sm:$0xff]  ;;  %v518_v41 = vmov 1   ;;  %vm408_vm6 = vcmask 15360  }
   0x3   :  { %v487_v7 = vpack.c.bf16 %v36_v6, %v35_v3  ;;  %v37_v10 = vld [vmem:[%s637_s1 + $0x20] sm:$0xff]  ;;  %v38_v11 = vld [vmem:[%s637_s1 + $0x28] sm:$0xff]  ;;  %v496_v12 = vpack.c.bf16 %v124_v9, %v123_v8  ;;  %v39_v14 = vld [vmem:[%s637_s1 + $0x30] sm:$0xff]  ;;  %510 = vset.pattern.permute.xlu1 %v518_v41  ;;  %509 = vset.pattern.permute.xlu0 %v518_v41  ;;  %v395_v62 = vand.u32 127, %v394_v61 }
   0x4   :  { %485 = vmatpush3.bf16.msra.mxu0 %v484_v5  ;;  %v490_v13 = vpack.c.bf16 %v38_v11, %v37_v10  ;;  %v40_v15 = vld [vmem:[%s637_s1 + $0x38] sm:$0xff]  ;;  %v32_v17 = vld [vmem:[%s639_s0] sm:$0xff]  ;;  %v125_v18 = vld [vmem:[%s638_s3 + $0x10] sm:$0xff] }
   0x5   :  { %486 = vmatprep.subr.bf16.mxu0 %v515_v0  ;;  %497 = vmatpush3.bf16.msra.mxu1 %v496_v12  ;;  %v493_v16 = vpack.c.bf16 %v40_v15, %v39_v14  ;;  %v126_v19 = vld [vmem:[%s638_s3 + $0x18] sm:$0xff]  ;;  %v414_v21 = vld [vmem:[%s640_s2] ss:$0 sm:$0xff]  ;;  %v210_v27 = vld [vmem:[%s641_s5 + $0x8] sm:$0xff]  ;;  %vm396_vm5 = vcmp.eq.s32.totalorder %v395_v62, 0 }
   0x6   :  { %498 = vmatprep.subr.bf16.mxu1 %v515_v0  ;;  %v499_v20 = vpack.c.bf16 %v126_v19, %v125_v18  ;;  %v209_v26 = vld [vmem:[%s641_s5] sm:$0xff] }
   0x7   :  { %v502_v28 = vpack.c.bf16 %v210_v27, %v209_v26  ;;  %v416_v29 = vld [vmem:[%s642_s4] ss:$0 sm:$0xff] }
   0x8   :  { %488 = vmatpush3.bf16.msra.mxu0 %v487_v7  ;;  %v293_v34 = vld [vmem:[%s643_s7] sm:$0xff]  ;;  %s519_s7 = smov 1  }
   0x9   :  { %489 = vmatprep.subr.bf16.mxu0 %v515_v0  ;;  %500 = vmatpush3.bf16.msra.mxu1 %v499_v20  ;;  %v418_v35 = vld [vmem:[%s644_s6] ss:$0 sm:$0xff] }
   0xa   :  { %501 = vmatprep.subr.bf16.mxu1 %v515_v0  ;;  %v420_v40 = vld [vmem:[%s645_s8] ss:$0 sm:$0xff] }
   0xc   :  { %491 = vmatpush3.bf16.msra.mxu0 %v490_v13 }
   0xd   :  { %492 = vmatprep.subr.bf16.mxu0 %v515_v0 }
  0x10   :  { %494 = vmatpush3.bf16.msra.mxu0 %v493_v16 }
  0x13   :  { %458 = vmatmul.mubr.msk.f32.vlgmr.msra.gmra.mrb[0].mxu0 %vm48_vm1, %v32_v17 }
  0xe6   :  { %v118_v22 = vpop.f32.mrb[0].mxu0 }
  0xe7   :  { %v119_v23 = vadd.f32 %v414_v21, %v118_v22  ;;  %v459_v24 = vpop.f32.mrb[1].mxu0 }
  0xe9   :  { %v122_v25 = vmax.f32 %v119_v23, 0.0 }
  0xeb   :  { %469 = vmatmul.mubr.msk.f32.vlgmr.msra.gmra.mrb[0].mxu1 %vm134_vm2, %v122_v25 }
  0xec   :  { %475 = vmatprep.mubr.msk.f32.mxu1 %vm516_vm0, %v517_v4  ;;  %503 = vmatpush3.bf16.msra.mxu1 %v502_v28 }
  0xed   :  { %478 = vmatprep.subr.mxu1 %v517_v4 }
 0x1be   :  { %v204_v30 = vpop.f32.mrb[0].mxu1 }
 0x1bf   :  { %v205_v31 = vadd.f32 %v416_v29, %v204_v30  ;;  %v470_v32 = vpop.f32.mrb[1].mxu1 }
 0x1c1   :  { %v208_v33 = vmax.f32 %v205_v31, 0.0 }
 0x1c3   :  { %476 = vmatmul.mubr.msk.f32.vlgmr.msra.gmra.mrb[2].mxu1 %vm218_vm3, %v208_v33 }
 0x1c4   :  { %480 = vmatprep.mubr.msk.f32.mxu1 %vm516_vm0, %v517_v4  ;;  %479 = vmatpush3.msra.mxu1 %v293_v34 }
 0x296   :  { %v288_v36 = vpop.f32.mrb[2].mxu1 }
 0x297   :  { %v289_v37 = vadd.f32 %v418_v35, %v288_v36  ;;  %v477_v38 = vpop.f32.mrb[3].mxu1 }
 0x299   :  { %v292_v39 = vmax.f32 %v289_v37, 0.0 }
 0x29b   :  { %481 = vmatmul.mubr.msk.f32.vlgmr.msra.gmra.mrb[4].mxu1 %vm301_vm4, %v292_v39 }
 0x36e   :  { %v371_v42 = vpop.f32.mrb[4].mxu1 }
 0x36f   :  { %v372_v43 = vadd.f32 %v420_v40, %v371_v42  ;;  %v482_v44 = vpop.f32.mrb[5].mxu1 }
 0x371   :  { %376 = vrot.lane.b32.xlu0 %v372_v43, %s519_s7 }
 0x3e3   :  { %v377_v45 = vpop.permute.xlu0 %376 }
 0x3e4   :  { %v379_v46 = vsub.f32 %v372_v43, %v377_v45 }
 0x3e6   :  { %v380_v47 = vand.u32 2147483647, %v379_v46  ;;  %v390_v52 = vsub.f32 0.0, %v379_v46  ;;  %v387_v54 = vmax.f32 %v379_v46, 0.0 }
 0x3e8   :  { %v381_v48 = vsub.f32 0.0, %v380_v47  ;;  %v391_v56 = vmax.f32 %v390_v52, 0.0 }
 0x3ea   :  { %v382_v49 = vmul.f32 1.442695, %v381_v48 }
 0x3ec   :  { %511 = vpow2.f32 %v382_v49 }
 0x3f6   :  { %v512_v50 = vpop.eup %511 }
 0x3f7   :  { %v384_v51 = vadd.f32 1.0, %v512_v50 }
 0x3f9   :  { %513 = vlog2.f32 %v384_v51 }
 0x403   :  { %v514_v53 = vpop.eup %513 }
 0x404   :  { %v386_v55 = vmul.f32 0.6931472, %v514_v53 }
 0x406   :  { %v392_v57 = vadd.f32 %v391_v56, %v386_v55  ;;  %v388_v58 = vadd.f32 %v387_v54, %v386_v55 }
 0x408   :  { %v393_v59 = vsub.f32 0.0, %v392_v57  ;;  %v389_v60 = vsub.f32 0.0, %v388_v58 }
 0x40a   :  { %404 = vperm.xlu1 %510, %v393_v59   ;;  %399 = vperm.xlu0 %509, %v389_v60  }
 0x489   :  { %v405_v63 = vpop.permute.xlu1 %404  ;;  %v400_v0 = vpop.permute.xlu0 %399 }
 0x48a   :  { %v407_v1 = vsel %vm396_vm5, %v400_v0, %v405_v63 }
 0x48b   :  { %409 = vst.msk [vmem:[%s646_s9] sm:$0xff] %vm408_vm6, %v407_v1 }

</bundles_post_ra>
